<compile_context>
chip_gen: v5e
topology: v5e:2x2
jax: 0.10.0
libtpu: 0.0.40
codegen_flags: <defaults>
</compile_context>

<pallas_src>
import jax
import jax.numpy as jnp
from jax.experimental import pallas as pl
from jax.experimental.pallas import tpu as pltpu

_LANES = 128
_MAX_BLOCK_ROWS = 1024   # (1024, 128) f32 tile = 512 KiB; in+out double-buffered ~2 MiB


def _affine_kernel(wb_ref, x_ref, o_ref):
    # y = x * w + b elementwise on the VPU (w, b are scalars from SMEM).
    w = wb_ref[0]
    b = wb_ref[1]
    o_ref[...] = (x_ref[...].astype(jnp.float32) * w + b).astype(o_ref.dtype)


def linear_regression_v2(x: jnp.ndarray, w: jnp.ndarray, b: jnp.ndarray,
                         *, min_pallas_elems: int = 1024) -> jnp.ndarray:
    """Pallas implementation of nn.Linear(1, 1) forward: (N, 1) -> (N, 1)."""
    n, in_f = x.shape
    assert in_f == 1 and w.shape == (1, 1) and b.shape == (1,)

    wb = jnp.concatenate([w.reshape(-1), b.reshape(-1)]).astype(jnp.float32)

    if n < min_pallas_elems:
        # Launch + DMA setup cost dwarfs a few multiply-adds: let XLA fuse it.
        y = x.astype(jnp.float32) * wb[0] + wb[1]
        return y.astype(x.dtype).reshape(n, 1)

    # ---- lane-dense repack: N scalars -> (rows_padded, 128) slab ----
    rows = (n + _LANES - 1) // _LANES
    rows8 = ((rows + 7) // 8) * 8                      # satisfy (8, 128) tiling
    block_rows = min(_MAX_BLOCK_ROWS, rows8)
    rows_padded = ((rows8 + block_rows - 1) // block_rows) * block_rows
    pad = rows_padded * _LANES - n

    x_slab = jnp.pad(x.reshape(-1), (0, pad)).reshape(rows_padded, _LANES)
    grid = (rows_padded // block_rows,)

    out_slab = pl.pallas_call(
        _affine_kernel,
        out_shape=jax.ShapeDtypeStruct((rows_padded, _LANES), x.dtype),
        grid_spec=pltpu.PrefetchScalarGridSpec(
            num_scalar_prefetch=0,
            grid=grid,
            in_specs=[
                pl.BlockSpec(memory_space=pltpu.SMEM),                # (2,) w,b scalars
                pl.BlockSpec((block_rows, _LANES), lambda i: (i, 0)),  # x tile
            ],
            out_specs=pl.BlockSpec((block_rows, _LANES), lambda i: (i, 0)),
        ),
        compiler_params=pltpu.CompilerParams(
            dimension_semantics=("parallel",),
        ),
    )(wb, x_slab)

    # Drop padding and restore the (N, 1) nn.Linear output layout.
    return out_slab.reshape(-1)[:n].reshape(n, 1)


if __name__ == "__main__":
    key = jax.random.PRNGKey(0)
    k_w, k_b, k_x1, k_x2 = jax.random.split(key, 4)

    # nn.Linear(1, 1) params: weight (1, 1), bias (1,)
    w = jax.random.uniform(k_w, (1, 1), jnp.float32, minval=-1.0, maxval=1.0)
    b = jax.random.uniform(k_b, (1,), jnp.float32, minval=-1.0, maxval=1.0)

    # 1) Tiny batch (8, 1): fast path (no Pallas launch), semantics identical.
    x_small = jax.random.normal(k_x1, (8, 1), jnp.float32)
    out_small = jax.block_until_ready(linear_regression_v2(x_small, w, b))
    ref_small = x_small @ w.T + b
    assert out_small.shape == (8, 1) and out_small.dtype == jnp.float32
    assert jnp.allclose(out_small, ref_small, atol=1e-6), "small-N mismatch"

    # 2) Larger batch: exercises the lane-dense, tiled, multi-block Pallas path
    #    (rows=2344 -> 3 grid steps of (1024, 128) tiles, with padding sliced off).
    n = 300_000
    x_big = jax.random.normal(k_x2, (n, 1), jnp.float32)
    out_big = jax.block_until_ready(linear_regression_v2(x_big, w, b))
    ref_big = x_big @ w.T + b
    assert out_big.shape == (n, 1) and out_big.dtype == jnp.float32
    assert jnp.allclose(out_big, ref_big, atol=1e-6), "pallas path mismatch"

    print("KERNEL_OK")
</pallas_src>

<mosaic_0001>
module attributes {stable_mosaic.version = 11 : i64} {
  func.func @_affine_kernel(%arg0: i32, %arg1: memref<2xf32, #tpu.memory_space<smem>>, %arg2: memref<1024x128xf32, #tpu.memory_space<vmem>>, %arg3: memref<1024x128xf32, #tpu.memory_space<vmem>>) attributes {dimension_semantics = [#tpu.dimension_semantics<parallel>], iteration_bounds = array<i64: 3>, scalar_prefetch = 0 : i64, scratch_operands = 0 : i64, tpu.core_type = #tpu.core_type<tc>, window_params = [{transform_indices = @transform_0, window_bounds = array<i64: 2>}, {transform_indices = @transform_1, window_bounds = array<i64: 1024, 128>}, {transform_indices = @transform_2, window_bounds = array<i64: 1024, 128>}]} {
    %c0 = arith.constant 0 : index
    %0 = memref.load %arg1[%c0] : memref<2xf32, #tpu.memory_space<smem>>
    %c1 = arith.constant 1 : index
    %1 = memref.load %arg1[%c1] : memref<2xf32, #tpu.memory_space<smem>>
    %c0_0 = arith.constant 0 : index
    %c0_1 = arith.constant 0 : index
    %2 = vector.load %arg2[%c0_0, %c0_1] : memref<1024x128xf32, #tpu.memory_space<vmem>>, vector<1024x128xf32>
    %3 = vector.broadcast %0 : f32 to vector<1024x128xf32>
    %4 = arith.mulf %2, %3 : vector<1024x128xf32>
    %5 = vector.broadcast %1 : f32 to vector<1024x128xf32>
    %6 = arith.addf %4, %5 : vector<1024x128xf32>
    %c0_2 = arith.constant 0 : index
    %c0_3 = arith.constant 0 : index
    %7 = vector.load %arg3[%c0_2, %c0_3] : memref<1024x128xf32, #tpu.memory_space<vmem>>, vector<1024x128xf32>
    tpu.vector_store %arg3[%c0_2, %c0_3], %6 {strides = array<i32>} : memref<1024x128xf32, #tpu.memory_space<vmem>>, vector<1024x128xf32>,
    return
  }
  func.func @transform_0(%arg0: i32) -> i32 {
    %c0_i32 = arith.constant 0 : i32
    %c0_i32_0 = arith.constant 0 : i32
    return %c0_i32 : i32
  }
  func.func @transform_1(%arg0: i32) -> (i32, i32) {
    %c0_i32 = arith.constant 0 : i32
    %c0_i32_0 = arith.constant 0 : i32
    return %arg0, %c0_i32 : i32, i32
  }
  func.func @transform_2(%arg0: i32) -> (i32, i32) {
    %c0_i32 = arith.constant 0 : i32
    %c0_i32_0 = arith.constant 0 : i32
    return %arg0, %c0_i32 : i32, i32
  }
}

</mosaic_0001>

<bundles_post_ra>
// kernel: tpu_custom_call.1
= control target key start
LH: loop header
LB: loop body
LE: loop exit
PB: predicated region body
PF: predicated region fallthrough
CT: control target
= control target key end

     0   :  { %7 = vsyncpa [#allocation5], 0  ;;  %s1679_s0 = inlined_call_operand.hbm [shape: f32[2], index: 0, kind: input, shape index: {}]   ;;  %s1680_s1 = inlined_call_operand.hbm [shape: f32[3072,128], index: 1, kind: input, shape index: {}]   ;;  %s1681_s2 = inlined_call_operand.hbm [shape: f32[3072,128], index: 2, kind: output, shape index: {}]  }
   0x1   :  { %8 = vsyncpa [#allocation3], 0 }
   0x2   :  { %10 = vsyncpa [#allocation3 + $0x1], 0 }
   0x3   :  { %11 = vsyncpa [#allocation4], 0 }
   0x4   :  { %13 = vsyncpa [#allocation4 + $0x1], 0  ;;  %s1014_s9 = smov 0   ;;  %s1016_s10 = smov 0  }
   0x5   :  { %s1018_s11 = smov 0   ;;  %s1020_s12 = smov 0  }
   0x6 LB: > { %s1035_s13 = sadd.s32 4294967295, %s992_s12   ;;  %s797_s14 = sadd.s32 4294967294, %s992_s12   ;;  %s992_s12 = sphi %s1020_s12, %s1691_s12   ;;  %s988_s11 = sphi %s1018_s11, %s1690_s11   ;;  %s984_s10 = sphi %s1016_s10, %s1689_s10   ;;  %s980_s9 = sphi %s1014_s9, %s1688_s9  }
   0x7   : > { %s1039_s15 = sadd.s32 1, %s992_s12   ;;  %s47_s16 = sadd.s32 1, %s988_s11 }
   0x8   : > { %s44_s17 = ssub.s32 %s992_s12, %s1039_s15  ;;  %p54_p0 = scmp.ne.s32.totalorder %s988_s11, %s984_s10 }
   0x9   : > { %p45_p1 = scmp.eq.s32.totalorder %s44_s17, 0  ;;  %p55_p2 = scmp.eq.s32.totalorder %s992_s12, 0 }
   0xa   : > { %p60_p3 = scmp.ne.s32.totalorder %s984_s10, %s980_s9  ;;  %p61_p4 = scmp.eq.s32.totalorder %s1035_s13, 0 }
   0xb   : > { %s1051_s18 = scalar_select %p45_p1, %s988_s11, %s47_s16  }
   0xc   : > { %p1053_p5 = por %p55_p2, %p54_p0  ;;  %p1059_p6 = por %p61_p4, %p60_p3 }
   0xd   : > { %p84_p7 = scmp.eq.s32.totalorder %s1035_s13, 2  ;;  %p90_p8 = scmp.eq.s32.totalorder %s797_s14, 2 }
   0xe   : > { %p798_p9 = scmp.ge.s32.totalorder %s992_s12, 1  ;;  %p97_p10 = scmp.lt.s32.totalorder %s992_s12, 4 }
   0xf   : > { %p1066_p11 = por %p84_p7, %p54_p0  ;;  %p1070_p12 = por %p90_p8, %p60_p3 }
  0x10   : > { %p1074_p13 = pnand %p798_p9, %p97_p10  ;;  %s109_s26 = sshll.u32 %s1679_s0, 4  ;;  %s110_s26 = int_to_ptr.hbm [resolvable:$true] %s109_s26 }
  0x11   : > { %p837_p0 = scmp.lt.s32.totalorder %s992_s12, 3  ;;  %s120_s27 = sand.u32 1, %s988_s11  }
  0x12   : > { %p824_p1 = pneg %p1074_p13  ;;  %s801_s29 = sshll.u32 %s120_s27, 10 }
  0x13   : > { %p1089_p3 = pnand %p837_p0, %p1053_p5  ;;  %s994_s30 = smov [#allocation2]  }
  0x14   : > { %p825_p2 = pnand %p824_p1, %p61_p4  ;;  %s814_s3 = sshll.u32 %s992_s12, 10 }
  0x15   : > { %s124_s4 = scalar_lea.vmem [#allocation6], %s801_s29  ;;  %s129_s8 = scalar_lea.hbm %s1680_s1, %s814_s3 }
  0x16   : > { %827 = dma.hbm_to_smem (!%p825_p2), %s110_s26, 16, %s994_s30, [#allocation5]  }
  0x17   : > { %s132_s5 = sshll.u32 %s124_s4, 4  ;;  %s130_s14 = sshll.u32 %s129_s8, 4  ;;  %s133_s5 = int_to_ptr.vmem [resolvable:$true] %s132_s5  ;;  %s131_s14 = int_to_ptr.hbm [resolvable:$true] %s130_s14 }
  0x18   : > { %s121_s16 = scalar_lea.sflag [#allocation3], %s120_s27  ;;  %s892_s17 = sshra.s32 %s131_s14, 4  ;;  %s893_s17 = int_to_ptr.hbm [resolvable:$true] %s892_s17 }
  0x19   : > { %s894_s19 = scalar_lea.hbm %s893_s17, 1024  ;;  %p896_p7 = pneg %p1089_p3 }
  0x1a   : > { %p895_p5 = scmp.ne.s32.totalorder %s893_s17, %s894_s19  ;;  %s899_s26 = scalar_lea.hbm %s1680_s1, 3072 }
  0x1b   : > { %p900_p10 = scmp.lt.s32.totalorder %s893_s17, %s1680_s1  ;;  %p901_p1 = scmp.lt.s32.totalorder %s899_s26, %s894_s19 }
  0x1c   : > { %p897_p8 = pnand %p896_p7, %p895_p5 }
  0x1d   : > { %p902_p0 = por %p901_p1, %p900_p10 }
  0x1e   : > { %p898_p9 = pneg %p897_p8 }
  0x20   : > { %p903_p2 = pnand %p902_p0, %p898_p9 }
  0x22   : > { %906 = shalt.err (!%p903_p2)
}
  0x23   : > { %s995_s27 = smov 128   ;;  %s996_s3 = smov 8  }
  0x24   : > { %831 = dma.hbm_to_vmem [thread:$0]  (!%p1089_p3), %s131_s14, 16384, %s133_s5, %s121_s16, %s995_s27, %s995_s27, %s996_s3  }
  0x25   : > { %144 = sbr.rel (%p1074_p13) target bundleno = 191 (0xbf), region = 28 }
  0x2a   : > { %967 = dma.done.wait (%p61_p4), [#allocation5], 16  }
  0x2b   : > { %969 = vsyncadd (%p61_p4), [#allocation5], 4294967280  ;;  %s1114_s4 = sand.u32 1, %s984_s10  }
  0x2c   : > { %s806_s6 = sshll.u32 %s1114_s4, 10  ;;  %s152_s7 = scalar_lea.sflag [#allocation3], %s1114_s4 }
  0x2d   : > { %s1120_s28 = scalar_lea.vmem [#allocation6], %s806_s6 }
  0x2e   : > { %971 = dma.done.wait (%p1059_p6), %s152_s7, 16384  }
  0x2f   : > { %973 = vsyncadd (%p1059_p6), %s152_s7, 4294950912 }
  0x30   : > { %161 = sfence }
  0x31   : > { %s180_s23 = sld [smem:[#allocation2]]  ;;  %v182_v0 = vld [vmem:[%s1120_s28] sm:$0xff]  ;;  %v183_v1 = vld [vmem:[%s1120_s28 + $0x8] sm:$0xff]  ;;  %v184_v2 = vld [vmem:[%s1120_s28 + $0x10] sm:$0xff]  ;;  %s1155_s20 = scalar_lea.vmem [#allocation7], %s806_s6 }
  0x32   : > { %s808_s5 = sld [smem:[#allocation2 + $0x1]]  ;;  %v185_v3 = vld [vmem:[%s1120_s28 + $0x18] sm:$0xff]  ;;  %v186_v4 = vld [vmem:[%s1120_s28 + $0x20] sm:$0xff]  ;;  %v187_v5 = vld [vmem:[%s1120_s28 + $0x28] sm:$0xff]  ;;  %s815_s8 = sshll.u32 %s1035_s13, 10 }
  0x33   : > { %v188_v7 = vld [vmem:[%s1120_s28 + $0x30] sm:$0xff]  ;;  %v189_v12 = vld [vmem:[%s1120_s28 + $0x38] sm:$0xff]  ;;  %v190_v16 = vld [vmem:[%s1120_s28 + $0x40] sm:$0xff]  ;;  %s708_s16 = scalar_lea.hbm %s1681_s2, %s815_s8  ;;  %s709_s17 = sshll.u32 %s1155_s20, 4  ;;  %s710_s17 = int_to_ptr.vmem [resolvable:$true] %s709_s17 }
  0x34   : > { %v191_v21 = vld [vmem:[%s1120_s28 + $0x48] sm:$0xff]  ;;  %v192_v24 = vld [vmem:[%s1120_s28 + $0x50] sm:$0xff]  ;;  %v193_v27 = vld [vmem:[%s1120_s28 + $0x58] sm:$0xff]  ;;  %s711_s19 = sshll.u32 %s708_s16, 4  ;;  %s697_s24 = scalar_lea.sflag [#allocation4], %s1114_s4  ;;  %s712_s19 = int_to_ptr.hbm [resolvable:$true] %s711_s19 }
  0x35   : > { %v194_v30 = vld [vmem:[%s1120_s28 + $0x60] sm:$0xff]  ;;  %v195_v33 = vld [vmem:[%s1120_s28 + $0x68] sm:$0xff]  ;;  %v196_v36 = vld [vmem:[%s1120_s28 + $0x70] sm:$0xff]  ;;  %s936_s25 = sshra.s32 %s712_s19, 4  ;;  %s942_s27 = scalar_lea.hbm %s1681_s2, 3072  ;;  %s937_s25 = int_to_ptr.hbm [resolvable:$true] %s936_s25 }
  0x36   : > { %v197_v39 = vld [vmem:[%s1120_s28 + $0x78] sm:$0xff]  ;;  %v198_v42 = vld [vmem:[%s1120_s28 + $0x80] sm:$0xff]  ;;  %v199_v45 = vld [vmem:[%s1120_s28 + $0x88] sm:$0xff]  ;;  %s938_s26 = scalar_lea.hbm %s937_s25, 1024  ;;  %p943_p3 = scmp.lt.s32.totalorder %s937_s25, %s1681_s2 }
  0x37   : > { %v1132_v6 = vstv %s180_s23  ;;  %v200_v48 = vld [vmem:[%s1120_s28 + $0x90] sm:$0xff]  ;;  %v201_v51 = vld [vmem:[%s1120_s28 + $0x98] sm:$0xff]  ;;  %v202_v54 = vld [vmem:[%s1120_s28 + $0xa0] sm:$0xff]  ;;  %p939_p4 = scmp.ne.s32.totalorder %s937_s25, %s938_s26  ;;  %p944_p5 = scmp.lt.s32.totalorder %s942_s27, %s938_s26 }
  0x38   : > { %v311_v8 = vmul.f32 %v1132_v6, %v182_v0  ;;  %v1136_v9 = vstv %s808_s5  ;;  %v312_v10 = vmul.f32 %v1132_v6, %v183_v1  ;;  %v313_v11 = vmul.f32 %v1132_v6, %v184_v2  ;;  %v203_v57 = vld [vmem:[%s1120_s28 + $0xa8] sm:$0xff]  ;;  %v204_v60 = vld [vmem:[%s1120_s28 + $0xb0] sm:$0xff]  ;;  %v205_v63 = vld [vmem:[%s1120_s28 + $0xb8] sm:$0xff] }
  0x39   : > { %v314_v13 = vmul.f32 %v1132_v6, %v185_v3  ;;  %v315_v14 = vmul.f32 %v1132_v6, %v186_v4  ;;  %v316_v15 = vmul.f32 %v1132_v6, %v187_v5  ;;  %v317_v20 = vmul.f32 %v1132_v6, %v188_v7  ;;  %v206_v2 = vld [vmem:[%s1120_s28 + $0xc0] sm:$0xff]  ;;  %v207_v5 = vld [vmem:[%s1120_s28 + $0xc8] sm:$0xff]  ;;  %p940_p6 = pnand %p939_p4, %p1066_p11  ;;  %p945_p7 = por %p944_p5, %p943_p3 }
  0x3a   : > { %v440_v17 = vadd.f32 %v1136_v9, %v311_v8  ;;  %v441_v18 = vadd.f32 %v1136_v9, %v312_v10  ;;  %v442_v19 = vadd.f32 %v1136_v9, %v313_v11  ;;  %v318_v23 = vmul.f32 %v1132_v6, %v189_v12  ;;  %v208_v10 = vld [vmem:[%s1120_s28 + $0xd0] sm:$0xff] }
  0x3b   : > { %v443_v22 = vadd.f32 %v1136_v9, %v314_v13  ;;  %v444_v25 = vadd.f32 %v1136_v9, %v315_v14  ;;  %v319_v26 = vmul.f32 %v1132_v6, %v190_v16  ;;  %v445_v28 = vadd.f32 %v1136_v9, %v316_v15  ;;  %v209_v13 = vld [vmem:[%s1120_s28 + $0xd8] sm:$0xff]  ;;  %v210_v16 = vld [vmem:[%s1120_s28 + $0xe0] sm:$0xff]  ;;  %p941_p13 = pneg %p940_p6 }
  0x3c   : > { %568 = vst [vmem:[%s1155_s20] sm:$0xff] %v440_v17  ;;  %v320_v29 = vmul.f32 %v1132_v6, %v191_v21  ;;  %v446_v31 = vadd.f32 %v1136_v9, %v317_v20  ;;  %v321_v32 = vmul.f32 %v1132_v6, %v192_v24  ;;  %v447_v34 = vadd.f32 %v1136_v9, %v318_v23 }
  0x3d   : > { %569 = vst [vmem:[%s1155_s20 + $0x8] sm:$0xff] %v441_v18  ;;  %v322_v35 = vmul.f32 %v1132_v6, %v193_v27  ;;  %v448_v37 = vadd.f32 %v1136_v9, %v319_v26  ;;  %v323_v38 = vmul.f32 %v1132_v6, %v194_v30  ;;  %v324_v41 = vmul.f32 %v1132_v6, %v195_v33  ;;  %p946_p8 = pnand %p945_p7, %p941_p13 }
  0x3e   : > { %570 = vst [vmem:[%s1155_s20 + $0x10] sm:$0xff] %v442_v19  ;;  %v449_v40 = vadd.f32 %v1136_v9, %v320_v29  ;;  %v450_v43 = vadd.f32 %v1136_v9, %v321_v32  ;;  %v325_v44 = vmul.f32 %v1132_v6, %v196_v36  ;;  %v326_v47 = vmul.f32 %v1132_v6, %v197_v39  ;;  %v211_v19 = vld [vmem:[%s1120_s28 + $0xe8] sm:$0xff] }
  0x3f   : > { %571 = vst [vmem:[%s1155_s20 + $0x18] sm:$0xff] %v443_v22  ;;  %v451_v46 = vadd.f32 %v1136_v9, %v322_v35  ;;  %v452_v49 = vadd.f32 %v1136_v9, %v323_v38  ;;  %v327_v50 = vmul.f32 %v1132_v6, %v198_v42  ;;  %v453_v52 = vadd.f32 %v1136_v9, %v324_v41  ;;  %v212_v22 = vld [vmem:[%s1120_s28 + $0xf0] sm:$0xff] }
  0x40   : > { %572 = vst [vmem:[%s1155_s20 + $0x20] sm:$0xff] %v444_v25  ;;  %v328_v53 = vmul.f32 %v1132_v6, %v199_v45  ;;  %v454_v55 = vadd.f32 %v1136_v9, %v325_v44  ;;  %v329_v56 = vmul.f32 %v1132_v6, %v200_v48  ;;  %v455_v58 = vadd.f32 %v1136_v9, %v326_v47  ;;  %v213_v25 = vld [vmem:[%s1120_s28 + $0xf8] sm:$0xff] }
  0x41   : > { %573 = vst [vmem:[%s1155_s20 + $0x28] sm:$0xff] %v445_v28  ;;  %v330_v59 = vmul.f32 %v1132_v6, %v201_v51  ;;  %v456_v61 = vadd.f32 %v1136_v9, %v327_v50  ;;  %v331_v62 = vmul.f32 %v1132_v6, %v202_v54  ;;  %v332_v1 = vmul.f32 %v1132_v6, %v203_v57  ;;  %v214_v28 = vld [vmem:[%s1120_s28 + $0x100] sm:$0xff] }
  0x42   : > { %574 = vst [vmem:[%s1155_s20 + $0x30] sm:$0xff] %v446_v31  ;;  %v457_v0 = vadd.f32 %v1136_v9, %v328_v53  ;;  %v458_v3 = vadd.f32 %v1136_v9, %v329_v56  ;;  %v333_v4 = vmul.f32 %v1132_v6, %v204_v60  ;;  %v334_v8 = vmul.f32 %v1132_v6, %v205_v63  ;;  %v215_v31 = vld [vmem:[%s1120_s28 + $0x108] sm:$0xff] }
  0x43   : > { %575 = vst [vmem:[%s1155_s20 + $0x38] sm:$0xff] %v447_v34  ;;  %v459_v7 = vadd.f32 %v1136_v9, %v330_v59  ;;  %v460_v11 = vadd.f32 %v1136_v9, %v331_v62  ;;  %v335_v12 = vmul.f32 %v1132_v6, %v206_v2  ;;  %v461_v14 = vadd.f32 %v1136_v9, %v332_v1  ;;  %v216_v34 = vld [vmem:[%s1120_s28 + $0x110] sm:$0xff] }
  0x44   : > { %576 = vst [vmem:[%s1155_s20 + $0x40] sm:$0xff] %v448_v37  ;;  %v336_v15 = vmul.f32 %v1132_v6, %v207_v5  ;;  %v462_v17 = vadd.f32 %v1136_v9, %v333_v4  ;;  %v337_v18 = vmul.f32 %v1132_v6, %v208_v10  ;;  %v463_v20 = vadd.f32 %v1136_v9, %v334_v8  ;;  %v217_v37 = vld [vmem:[%s1120_s28 + $0x118] sm:$0xff] }
  0x45   : > { %577 = vst [vmem:[%s1155_s20 + $0x48] sm:$0xff] %v449_v40  ;;  %v338_v21 = vmul.f32 %v1132_v6, %v209_v13  ;;  %v464_v23 = vadd.f32 %v1136_v9, %v335_v12  ;;  %v339_v24 = vmul.f32 %v1132_v6, %v210_v16  ;;  %v340_v27 = vmul.f32 %v1132_v6, %v211_v19  ;;  %v218_v40 = vld [vmem:[%s1120_s28 + $0x120] sm:$0xff] }
  0x46   : > { %578 = vst [vmem:[%s1155_s20 + $0x50] sm:$0xff] %v450_v43  ;;  %v465_v26 = vadd.f32 %v1136_v9, %v336_v15  ;;  %v466_v29 = vadd.f32 %v1136_v9, %v337_v18  ;;  %v341_v30 = vmul.f32 %v1132_v6, %v212_v22  ;;  %v342_v33 = vmul.f32 %v1132_v6, %v213_v25  ;;  %v219_v43 = vld [vmem:[%s1120_s28 + $0x128] sm:$0xff] }
  0x47   : > { %579 = vst [vmem:[%s1155_s20 + $0x58] sm:$0xff] %v451_v46  ;;  %v467_v32 = vadd.f32 %v1136_v9, %v338_v21  ;;  %v468_v35 = vadd.f32 %v1136_v9, %v339_v24  ;;  %v343_v36 = vmul.f32 %v1132_v6, %v214_v28  ;;  %v469_v38 = vadd.f32 %v1136_v9, %v340_v27  ;;  %v220_v46 = vld [vmem:[%s1120_s28 + $0x130] sm:$0xff] }
  0x48   : > { %580 = vst [vmem:[%s1155_s20 + $0x60] sm:$0xff] %v452_v49  ;;  %v344_v39 = vmul.f32 %v1132_v6, %v215_v31  ;;  %v470_v41 = vadd.f32 %v1136_v9, %v341_v30  ;;  %v345_v42 = vmul.f32 %v1132_v6, %v216_v34  ;;  %v471_v44 = vadd.f32 %v1136_v9, %v342_v33  ;;  %v221_v49 = vld [vmem:[%s1120_s28 + $0x138] sm:$0xff] }
  0x49   : > { %581 = vst [vmem:[%s1155_s20 + $0x68] sm:$0xff] %v453_v52  ;;  %v346_v45 = vmul.f32 %v1132_v6, %v217_v37  ;;  %v472_v47 = vadd.f32 %v1136_v9, %v343_v36  ;;  %v347_v48 = vmul.f32 %v1132_v6, %v218_v40  ;;  %v348_v51 = vmul.f32 %v1132_v6, %v219_v43  ;;  %v222_v52 = vld [vmem:[%s1120_s28 + $0x140] sm:$0xff] }
  0x4a   : > { %582 = vst [vmem:[%s1155_s20 + $0x70] sm:$0xff] %v454_v55  ;;  %v473_v50 = vadd.f32 %v1136_v9, %v344_v39  ;;  %v474_v53 = vadd.f32 %v1136_v9, %v345_v42  ;;  %v349_v54 = vmul.f32 %v1132_v6, %v220_v46  ;;  %v223_v55 = vld [vmem:[%s1120_s28 + $0x148] sm:$0xff]  ;;  %v350_v57 = vmul.f32 %v1132_v6, %v221_v49 }
  0x4b   : > { %583 = vst [vmem:[%s1155_s20 + $0x78] sm:$0xff] %v455_v58  ;;  %v475_v56 = vadd.f32 %v1136_v9, %v346_v45  ;;  %v224_v58 = vld [vmem:[%s1120_s28 + $0x150] sm:$0xff]  ;;  %v476_v59 = vadd.f32 %v1136_v9, %v347_v48  ;;  %v351_v60 = vmul.f32 %v1132_v6, %v222_v52  ;;  %v477_v62 = vadd.f32 %v1136_v9, %v348_v51 }
  0x4c   : > { %584 = vst [vmem:[%s1155_s20 + $0x80] sm:$0xff] %v456_v61  ;;  %v225_v61 = vld [vmem:[%s1120_s28 + $0x158] sm:$0xff]  ;;  %v352_v63 = vmul.f32 %v1132_v6, %v223_v55  ;;  %v478_v1 = vadd.f32 %v1136_v9, %v349_v54  ;;  %v353_v2 = vmul.f32 %v1132_v6, %v224_v58  ;;  %v479_v4 = vadd.f32 %v1136_v9, %v350_v57 }
  0x4d   : > { %585 = vst [vmem:[%s1155_s20 + $0x88] sm:$0xff] %v457_v0  ;;  %v226_v0 = vld [vmem:[%s1120_s28 + $0x160] sm:$0xff]  ;;  %v354_v5 = vmul.f32 %v1132_v6, %v225_v61  ;;  %v480_v8 = vadd.f32 %v1136_v9, %v351_v60 }
  0x4e   : > { %586 = vst [vmem:[%s1155_s20 + $0x90] sm:$0xff] %v458_v3  ;;  %v227_v3 = vld [vmem:[%s1120_s28 + $0x168] sm:$0xff]  ;;  %v355_v10 = vmul.f32 %v1132_v6, %v226_v0  ;;  %v481_v12 = vadd.f32 %v1136_v9, %v352_v63  ;;  %v482_v15 = vadd.f32 %v1136_v9, %v353_v2 }
  0x4f   : > { %587 = vst [vmem:[%s1155_s20 + $0x98] sm:$0xff] %v459_v7  ;;  %v228_v7 = vld [vmem:[%s1120_s28 + $0x170] sm:$0xff]  ;;  %v356_v13 = vmul.f32 %v1132_v6, %v227_v3  ;;  %v483_v18 = vadd.f32 %v1136_v9, %v354_v5 }
  0x50   : > { %588 = vst [vmem:[%s1155_s20 + $0xa0] sm:$0xff] %v460_v11  ;;  %v229_v11 = vld [vmem:[%s1120_s28 + $0x178] sm:$0xff]  ;;  %v357_v16 = vmul.f32 %v1132_v6, %v228_v7  ;;  %v484_v21 = vadd.f32 %v1136_v9, %v355_v10 }
  0x51   : > { %589 = vst [vmem:[%s1155_s20 + $0xa8] sm:$0xff] %v461_v14  ;;  %v230_v14 = vld [vmem:[%s1120_s28 + $0x180] sm:$0xff]  ;;  %v358_v19 = vmul.f32 %v1132_v6, %v229_v11  ;;  %v485_v24 = vadd.f32 %v1136_v9, %v356_v13 }
  0x52   : > { %590 = vst [vmem:[%s1155_s20 + $0xb0] sm:$0xff] %v462_v17  ;;  %v231_v17 = vld [vmem:[%s1120_s28 + $0x188] sm:$0xff]  ;;  %v359_v22 = vmul.f32 %v1132_v6, %v230_v14  ;;  %v486_v27 = vadd.f32 %v1136_v9, %v357_v16 }
  0x53   : > { %591 = vst [vmem:[%s1155_s20 + $0xb8] sm:$0xff] %v463_v20  ;;  %v232_v20 = vld [vmem:[%s1120_s28 + $0x190] sm:$0xff]  ;;  %v360_v25 = vmul.f32 %v1132_v6, %v231_v17  ;;  %v487_v30 = vadd.f32 %v1136_v9, %v358_v19 }
  0x54   : > { %592 = vst [vmem:[%s1155_s20 + $0xc0] sm:$0xff] %v464_v23  ;;  %v233_v23 = vld [vmem:[%s1120_s28 + $0x198] sm:$0xff]  ;;  %v361_v28 = vmul.f32 %v1132_v6, %v232_v20  ;;  %v488_v33 = vadd.f32 %v1136_v9, %v359_v22 }
  0x55   : > { %593 = vst [vmem:[%s1155_s20 + $0xc8] sm:$0xff] %v465_v26  ;;  %v234_v26 = vld [vmem:[%s1120_s28 + $0x1a0] sm:$0xff]  ;;  %v362_v31 = vmul.f32 %v1132_v6, %v233_v23  ;;  %v489_v36 = vadd.f32 %v1136_v9, %v360_v25 }
  0x56   : > { %594 = vst [vmem:[%s1155_s20 + $0xd0] sm:$0xff] %v466_v29  ;;  %v235_v29 = vld [vmem:[%s1120_s28 + $0x1a8] sm:$0xff]  ;;  %v363_v34 = vmul.f32 %v1132_v6, %v234_v26  ;;  %v490_v39 = vadd.f32 %v1136_v9, %v361_v28 }
  0x57   : > { %595 = vst [vmem:[%s1155_s20 + $0xd8] sm:$0xff] %v467_v32  ;;  %v236_v32 = vld [vmem:[%s1120_s28 + $0x1b0] sm:$0xff]  ;;  %v364_v37 = vmul.f32 %v1132_v6, %v235_v29  ;;  %v491_v42 = vadd.f32 %v1136_v9, %v362_v31 }
  0x58   : > { %596 = vst [vmem:[%s1155_s20 + $0xe0] sm:$0xff] %v468_v35  ;;  %v237_v35 = vld [vmem:[%s1120_s28 + $0x1b8] sm:$0xff]  ;;  %v365_v40 = vmul.f32 %v1132_v6, %v236_v32  ;;  %v492_v45 = vadd.f32 %v1136_v9, %v363_v34 }
  0x59   : > { %597 = vst [vmem:[%s1155_s20 + $0xe8] sm:$0xff] %v469_v38  ;;  %v238_v38 = vld [vmem:[%s1120_s28 + $0x1c0] sm:$0xff]  ;;  %v366_v43 = vmul.f32 %v1132_v6, %v237_v35  ;;  %v493_v48 = vadd.f32 %v1136_v9, %v364_v37 }
  0x5a   : > { %598 = vst [vmem:[%s1155_s20 + $0xf0] sm:$0xff] %v470_v41  ;;  %v239_v41 = vld [vmem:[%s1120_s28 + $0x1c8] sm:$0xff]  ;;  %v367_v46 = vmul.f32 %v1132_v6, %v238_v38  ;;  %v494_v51 = vadd.f32 %v1136_v9, %v365_v40 }
  0x5b   : > { %599 = vst [vmem:[%s1155_s20 + $0xf8] sm:$0xff] %v471_v44  ;;  %v240_v44 = vld [vmem:[%s1120_s28 + $0x1d0] sm:$0xff]  ;;  %v368_v49 = vmul.f32 %v1132_v6, %v239_v41  ;;  %v495_v54 = vadd.f32 %v1136_v9, %v366_v43 }
  0x5c   : > { %600 = vst [vmem:[%s1155_s20 + $0x100] sm:$0xff] %v472_v47  ;;  %v241_v47 = vld [vmem:[%s1120_s28 + $0x1d8] sm:$0xff]  ;;  %v369_v52 = vmul.f32 %v1132_v6, %v240_v44  ;;  %v496_v57 = vadd.f32 %v1136_v9, %v367_v46 }
  0x5d   : > { %601 = vst [vmem:[%s1155_s20 + $0x108] sm:$0xff] %v473_v50  ;;  %v242_v50 = vld [vmem:[%s1120_s28 + $0x1e0] sm:$0xff]  ;;  %v370_v55 = vmul.f32 %v1132_v6, %v241_v47  ;;  %v497_v60 = vadd.f32 %v1136_v9, %v368_v49 }
  0x5e   : > { %602 = vst [vmem:[%s1155_s20 + $0x110] sm:$0xff] %v474_v53  ;;  %v243_v53 = vld [vmem:[%s1120_s28 + $0x1e8] sm:$0xff]  ;;  %v371_v58 = vmul.f32 %v1132_v6, %v242_v50  ;;  %v498_v63 = vadd.f32 %v1136_v9, %v369_v52 }
  0x5f   : > { %603 = vst [vmem:[%s1155_s20 + $0x118] sm:$0xff] %v475_v56  ;;  %v244_v56 = vld [vmem:[%s1120_s28 + $0x1f0] sm:$0xff]  ;;  %v372_v61 = vmul.f32 %v1132_v6, %v243_v53  ;;  %v499_v2 = vadd.f32 %v1136_v9, %v370_v55 }
  0x60   : > { %604 = vst [vmem:[%s1155_s20 + $0x120] sm:$0xff] %v476_v59  ;;  %v245_v59 = vld [vmem:[%s1120_s28 + $0x1f8] sm:$0xff]  ;;  %v373_v0 = vmul.f32 %v1132_v6, %v244_v56  ;;  %v500_v5 = vadd.f32 %v1136_v9, %v371_v58 }
  0x61   : > { %605 = vst [vmem:[%s1155_s20 + $0x128] sm:$0xff] %v477_v62  ;;  %v246_v62 = vld [vmem:[%s1120_s28 + $0x200] sm:$0xff]  ;;  %v374_v3 = vmul.f32 %v1132_v6, %v245_v59  ;;  %v501_v10 = vadd.f32 %v1136_v9, %v372_v61 }
  0x62   : > { %606 = vst [vmem:[%s1155_s20 + $0x130] sm:$0xff] %v478_v1  ;;  %v247_v1 = vld [vmem:[%s1120_s28 + $0x208] sm:$0xff]  ;;  %v375_v7 = vmul.f32 %v1132_v6, %v246_v62  ;;  %v502_v13 = vadd.f32 %v1136_v9, %v373_v0 }
  0x63   : > { %607 = vst [vmem:[%s1155_s20 + $0x138] sm:$0xff] %v479_v4  ;;  %v248_v4 = vld [vmem:[%s1120_s28 + $0x210] sm:$0xff]  ;;  %v376_v11 = vmul.f32 %v1132_v6, %v247_v1  ;;  %v503_v16 = vadd.f32 %v1136_v9, %v374_v3 }
  0x64   : > { %608 = vst [vmem:[%s1155_s20 + $0x140] sm:$0xff] %v480_v8  ;;  %v249_v8 = vld [vmem:[%s1120_s28 + $0x218] sm:$0xff]  ;;  %v377_v14 = vmul.f32 %v1132_v6, %v248_v4  ;;  %v504_v19 = vadd.f32 %v1136_v9, %v375_v7 }
  0x65   : > { %609 = vst [vmem:[%s1155_s20 + $0x148] sm:$0xff] %v481_v12  ;;  %v250_v12 = vld [vmem:[%s1120_s28 + $0x220] sm:$0xff]  ;;  %v378_v17 = vmul.f32 %v1132_v6, %v249_v8  ;;  %v505_v22 = vadd.f32 %v1136_v9, %v376_v11 }
  0x66   : > { %610 = vst [vmem:[%s1155_s20 + $0x150] sm:$0xff] %v482_v15  ;;  %v251_v15 = vld [vmem:[%s1120_s28 + $0x228] sm:$0xff]  ;;  %v379_v20 = vmul.f32 %v1132_v6, %v250_v12  ;;  %v506_v25 = vadd.f32 %v1136_v9, %v377_v14 }
  0x67   : > { %611 = vst [vmem:[%s1155_s20 + $0x158] sm:$0xff] %v483_v18  ;;  %v252_v18 = vld [vmem:[%s1120_s28 + $0x230] sm:$0xff]  ;;  %v380_v23 = vmul.f32 %v1132_v6, %v251_v15  ;;  %v507_v28 = vadd.f32 %v1136_v9, %v378_v17 }
  0x68   : > { %612 = vst [vmem:[%s1155_s20 + $0x160] sm:$0xff] %v484_v21  ;;  %v253_v21 = vld [vmem:[%s1120_s28 + $0x238] sm:$0xff]  ;;  %v381_v26 = vmul.f32 %v1132_v6, %v252_v18  ;;  %v508_v31 = vadd.f32 %v1136_v9, %v379_v20 }
  0x69   : > { %613 = vst [vmem:[%s1155_s20 + $0x168] sm:$0xff] %v485_v24  ;;  %v254_v24 = vld [vmem:[%s1120_s28 + $0x240] sm:$0xff]  ;;  %v382_v29 = vmul.f32 %v1132_v6, %v253_v21  ;;  %v509_v34 = vadd.f32 %v1136_v9, %v380_v23 }
  0x6a   : > { %614 = vst [vmem:[%s1155_s20 + $0x170] sm:$0xff] %v486_v27  ;;  %v255_v27 = vld [vmem:[%s1120_s28 + $0x248] sm:$0xff]  ;;  %v383_v32 = vmul.f32 %v1132_v6, %v254_v24  ;;  %v510_v37 = vadd.f32 %v1136_v9, %v381_v26 }
  0x6b   : > { %615 = vst [vmem:[%s1155_s20 + $0x178] sm:$0xff] %v487_v30  ;;  %v256_v30 = vld [vmem:[%s1120_s28 + $0x250] sm:$0xff]  ;;  %v384_v35 = vmul.f32 %v1132_v6, %v255_v27  ;;  %v511_v40 = vadd.f32 %v1136_v9, %v382_v29 }
  0x6c   : > { %616 = vst [vmem:[%s1155_s20 + $0x180] sm:$0xff] %v488_v33  ;;  %v257_v33 = vld [vmem:[%s1120_s28 + $0x258] sm:$0xff]  ;;  %v385_v38 = vmul.f32 %v1132_v6, %v256_v30  ;;  %v512_v43 = vadd.f32 %v1136_v9, %v383_v32 }
  0x6d   : > { %617 = vst [vmem:[%s1155_s20 + $0x188] sm:$0xff] %v489_v36  ;;  %v258_v36 = vld [vmem:[%s1120_s28 + $0x260] sm:$0xff]  ;;  %v386_v41 = vmul.f32 %v1132_v6, %v257_v33  ;;  %v513_v46 = vadd.f32 %v1136_v9, %v384_v35 }
  0x6e   : > { %618 = vst [vmem:[%s1155_s20 + $0x190] sm:$0xff] %v490_v39  ;;  %v259_v39 = vld [vmem:[%s1120_s28 + $0x268] sm:$0xff]  ;;  %v387_v44 = vmul.f32 %v1132_v6, %v258_v36  ;;  %v514_v49 = vadd.f32 %v1136_v9, %v385_v38 }
  0x6f   : > { %619 = vst [vmem:[%s1155_s20 + $0x198] sm:$0xff] %v491_v42  ;;  %v260_v42 = vld [vmem:[%s1120_s28 + $0x270] sm:$0xff]  ;;  %v388_v47 = vmul.f32 %v1132_v6, %v259_v39  ;;  %v515_v52 = vadd.f32 %v1136_v9, %v386_v41 }
  0x70   : > { %620 = vst [vmem:[%s1155_s20 + $0x1a0] sm:$0xff] %v492_v45  ;;  %v261_v45 = vld [vmem:[%s1120_s28 + $0x278] sm:$0xff]  ;;  %v389_v50 = vmul.f32 %v1132_v6, %v260_v42  ;;  %v516_v55 = vadd.f32 %v1136_v9, %v387_v44 }
  0x71   : > { %621 = vst [vmem:[%s1155_s20 + $0x1a8] sm:$0xff] %v493_v48  ;;  %v262_v48 = vld [vmem:[%s1120_s28 + $0x280] sm:$0xff]  ;;  %v390_v53 = vmul.f32 %v1132_v6, %v261_v45  ;;  %v517_v58 = vadd.f32 %v1136_v9, %v388_v47 }
  0x72   : > { %622 = vst [vmem:[%s1155_s20 + $0x1b0] sm:$0xff] %v494_v51  ;;  %v263_v51 = vld [vmem:[%s1120_s28 + $0x288] sm:$0xff]  ;;  %v391_v56 = vmul.f32 %v1132_v6, %v262_v48  ;;  %v518_v61 = vadd.f32 %v1136_v9, %v389_v50 }
  0x73   : > { %623 = vst [vmem:[%s1155_s20 + $0x1b8] sm:$0xff] %v495_v54  ;;  %v264_v54 = vld [vmem:[%s1120_s28 + $0x290] sm:$0xff]  ;;  %v392_v59 = vmul.f32 %v1132_v6, %v263_v51  ;;  %v519_v0 = vadd.f32 %v1136_v9, %v390_v53 }
  0x74   : > { %624 = vst [vmem:[%s1155_s20 + $0x1c0] sm:$0xff] %v496_v57  ;;  %v265_v57 = vld [vmem:[%s1120_s28 + $0x298] sm:$0xff]  ;;  %v393_v62 = vmul.f32 %v1132_v6, %v264_v54  ;;  %v520_v3 = vadd.f32 %v1136_v9, %v391_v56 }
  0x75   : > { %625 = vst [vmem:[%s1155_s20 + $0x1c8] sm:$0xff] %v497_v60  ;;  %v266_v60 = vld [vmem:[%s1120_s28 + $0x2a0] sm:$0xff]  ;;  %v394_v1 = vmul.f32 %v1132_v6, %v265_v57  ;;  %v521_v7 = vadd.f32 %v1136_v9, %v392_v59 }
  0x76   : > { %626 = vst [vmem:[%s1155_s20 + $0x1d0] sm:$0xff] %v498_v63  ;;  %v267_v63 = vld [vmem:[%s1120_s28 + $0x2a8] sm:$0xff]  ;;  %v395_v4 = vmul.f32 %v1132_v6, %v266_v60  ;;  %v522_v11 = vadd.f32 %v1136_v9, %v393_v62 }
  0x77   : > { %627 = vst [vmem:[%s1155_s20 + $0x1d8] sm:$0xff] %v499_v2  ;;  %v268_v2 = vld [vmem:[%s1120_s28 + $0x2b0] sm:$0xff]  ;;  %v396_v8 = vmul.f32 %v1132_v6, %v267_v63  ;;  %v523_v14 = vadd.f32 %v1136_v9, %v394_v1 }
  0x78   : > { %628 = vst [vmem:[%s1155_s20 + $0x1e0] sm:$0xff] %v500_v5  ;;  %v269_v5 = vld [vmem:[%s1120_s28 + $0x2b8] sm:$0xff]  ;;  %v397_v12 = vmul.f32 %v1132_v6, %v268_v2  ;;  %v524_v17 = vadd.f32 %v1136_v9, %v395_v4 }
  0x79   : > { %629 = vst [vmem:[%s1155_s20 + $0x1e8] sm:$0xff] %v501_v10  ;;  %v270_v10 = vld [vmem:[%s1120_s28 + $0x2c0] sm:$0xff]  ;;  %v398_v15 = vmul.f32 %v1132_v6, %v269_v5  ;;  %v525_v20 = vadd.f32 %v1136_v9, %v396_v8 }
  0x7a   : > { %630 = vst [vmem:[%s1155_s20 + $0x1f0] sm:$0xff] %v502_v13  ;;  %v271_v13 = vld [vmem:[%s1120_s28 + $0x2c8] sm:$0xff]  ;;  %v399_v18 = vmul.f32 %v1132_v6, %v270_v10  ;;  %v526_v23 = vadd.f32 %v1136_v9, %v397_v12 }
  0x7b   : > { %631 = vst [vmem:[%s1155_s20 + $0x1f8] sm:$0xff] %v503_v16  ;;  %v272_v16 = vld [vmem:[%s1120_s28 + $0x2d0] sm:$0xff]  ;;  %v400_v21 = vmul.f32 %v1132_v6, %v271_v13  ;;  %v527_v26 = vadd.f32 %v1136_v9, %v398_v15 }
  0x7c   : > { %632 = vst [vmem:[%s1155_s20 + $0x200] sm:$0xff] %v504_v19  ;;  %v273_v19 = vld [vmem:[%s1120_s28 + $0x2d8] sm:$0xff]  ;;  %v401_v24 = vmul.f32 %v1132_v6, %v272_v16  ;;  %v528_v29 = vadd.f32 %v1136_v9, %v399_v18 }
  0x7d   : > { %633 = vst [vmem:[%s1155_s20 + $0x208] sm:$0xff] %v505_v22  ;;  %v274_v22 = vld [vmem:[%s1120_s28 + $0x2e0] sm:$0xff]  ;;  %v402_v27 = vmul.f32 %v1132_v6, %v273_v19  ;;  %v529_v32 = vadd.f32 %v1136_v9, %v400_v21 }
  0x7e   : > { %634 = vst [vmem:[%s1155_s20 + $0x210] sm:$0xff] %v506_v25  ;;  %v275_v25 = vld [vmem:[%s1120_s28 + $0x2e8] sm:$0xff]  ;;  %v403_v30 = vmul.f32 %v1132_v6, %v274_v22  ;;  %v530_v35 = vadd.f32 %v1136_v9, %v401_v24 }
  0x7f   : > { %635 = vst [vmem:[%s1155_s20 + $0x218] sm:$0xff] %v507_v28  ;;  %v276_v28 = vld [vmem:[%s1120_s28 + $0x2f0] sm:$0xff]  ;;  %v404_v33 = vmul.f32 %v1132_v6, %v275_v25  ;;  %v531_v38 = vadd.f32 %v1136_v9, %v402_v27 }
  0x80   : > { %636 = vst [vmem:[%s1155_s20 + $0x220] sm:$0xff] %v508_v31  ;;  %v277_v31 = vld [vmem:[%s1120_s28 + $0x2f8] sm:$0xff]  ;;  %v405_v36 = vmul.f32 %v1132_v6, %v276_v28  ;;  %v532_v41 = vadd.f32 %v1136_v9, %v403_v30 }
  0x81   : > { %637 = vst [vmem:[%s1155_s20 + $0x228] sm:$0xff] %v509_v34  ;;  %v278_v34 = vld [vmem:[%s1120_s28 + $0x300] sm:$0xff]  ;;  %v406_v39 = vmul.f32 %v1132_v6, %v277_v31  ;;  %v533_v44 = vadd.f32 %v1136_v9, %v404_v33 }
  0x82   : > { %638 = vst [vmem:[%s1155_s20 + $0x230] sm:$0xff] %v510_v37  ;;  %v279_v37 = vld [vmem:[%s1120_s28 + $0x308] sm:$0xff]  ;;  %v407_v42 = vmul.f32 %v1132_v6, %v278_v34  ;;  %v534_v47 = vadd.f32 %v1136_v9, %v405_v36 }
  0x83   : > { %639 = vst [vmem:[%s1155_s20 + $0x238] sm:$0xff] %v511_v40  ;;  %v280_v40 = vld [vmem:[%s1120_s28 + $0x310] sm:$0xff]  ;;  %v408_v45 = vmul.f32 %v1132_v6, %v279_v37  ;;  %v535_v50 = vadd.f32 %v1136_v9, %v406_v39 }
  0x84   : > { %640 = vst [vmem:[%s1155_s20 + $0x240] sm:$0xff] %v512_v43  ;;  %v281_v43 = vld [vmem:[%s1120_s28 + $0x318] sm:$0xff]  ;;  %v409_v48 = vmul.f32 %v1132_v6, %v280_v40  ;;  %v536_v53 = vadd.f32 %v1136_v9, %v407_v42 }
  0x85   : > { %641 = vst [vmem:[%s1155_s20 + $0x248] sm:$0xff] %v513_v46  ;;  %v282_v46 = vld [vmem:[%s1120_s28 + $0x320] sm:$0xff]  ;;  %v410_v51 = vmul.f32 %v1132_v6, %v281_v43  ;;  %v537_v56 = vadd.f32 %v1136_v9, %v408_v45 }
  0x86   : > { %642 = vst [vmem:[%s1155_s20 + $0x250] sm:$0xff] %v514_v49  ;;  %v283_v49 = vld [vmem:[%s1120_s28 + $0x328] sm:$0xff]  ;;  %v411_v54 = vmul.f32 %v1132_v6, %v282_v46  ;;  %v538_v59 = vadd.f32 %v1136_v9, %v409_v48 }
  0x87   : > { %643 = vst [vmem:[%s1155_s20 + $0x258] sm:$0xff] %v515_v52  ;;  %v284_v52 = vld [vmem:[%s1120_s28 + $0x330] sm:$0xff]  ;;  %v412_v57 = vmul.f32 %v1132_v6, %v283_v49  ;;  %v539_v62 = vadd.f32 %v1136_v9, %v410_v51 }
  0x88   : > { %644 = vst [vmem:[%s1155_s20 + $0x260] sm:$0xff] %v516_v55  ;;  %v285_v55 = vld [vmem:[%s1120_s28 + $0x338] sm:$0xff]  ;;  %v413_v60 = vmul.f32 %v1132_v6, %v284_v52  ;;  %v540_v1 = vadd.f32 %v1136_v9, %v411_v54 }
  0x89   : > { %645 = vst [vmem:[%s1155_s20 + $0x268] sm:$0xff] %v517_v58  ;;  %v286_v58 = vld [vmem:[%s1120_s28 + $0x340] sm:$0xff]  ;;  %v414_v63 = vmul.f32 %v1132_v6, %v285_v55  ;;  %v541_v4 = vadd.f32 %v1136_v9, %v412_v57 }
  0x8a   : > { %646 = vst [vmem:[%s1155_s20 + $0x270] sm:$0xff] %v518_v61  ;;  %v287_v61 = vld [vmem:[%s1120_s28 + $0x348] sm:$0xff]  ;;  %v415_v2 = vmul.f32 %v1132_v6, %v286_v58  ;;  %v542_v8 = vadd.f32 %v1136_v9, %v413_v60 }
  0x8b   : > { %647 = vst [vmem:[%s1155_s20 + $0x278] sm:$0xff] %v519_v0  ;;  %v288_v0 = vld [vmem:[%s1120_s28 + $0x350] sm:$0xff]  ;;  %v416_v5 = vmul.f32 %v1132_v6, %v287_v61  ;;  %v543_v12 = vadd.f32 %v1136_v9, %v414_v63 }
  0x8c   : > { %648 = vst [vmem:[%s1155_s20 + $0x280] sm:$0xff] %v520_v3  ;;  %v289_v3 = vld [vmem:[%s1120_s28 + $0x358] sm:$0xff]  ;;  %v417_v10 = vmul.f32 %v1132_v6, %v288_v0  ;;  %v544_v15 = vadd.f32 %v1136_v9, %v415_v2 }
  0x8d   : > { %649 = vst [vmem:[%s1155_s20 + $0x288] sm:$0xff] %v521_v7  ;;  %v290_v7 = vld [vmem:[%s1120_s28 + $0x360] sm:$0xff]  ;;  %v418_v13 = vmul.f32 %v1132_v6, %v289_v3  ;;  %v545_v18 = vadd.f32 %v1136_v9, %v416_v5 }
  0x8e   : > { %650 = vst [vmem:[%s1155_s20 + $0x290] sm:$0xff] %v522_v11  ;;  %v291_v11 = vld [vmem:[%s1120_s28 + $0x368] sm:$0xff]  ;;  %v419_v16 = vmul.f32 %v1132_v6, %v290_v7  ;;  %v546_v21 = vadd.f32 %v1136_v9, %v417_v10 }
  0x8f   : > { %651 = vst [vmem:[%s1155_s20 + $0x298] sm:$0xff] %v523_v14  ;;  %v292_v14 = vld [vmem:[%s1120_s28 + $0x370] sm:$0xff]  ;;  %v420_v19 = vmul.f32 %v1132_v6, %v291_v11  ;;  %v547_v24 = vadd.f32 %v1136_v9, %v418_v13 }
  0x90   : > { %652 = vst [vmem:[%s1155_s20 + $0x2a0] sm:$0xff] %v524_v17  ;;  %v293_v17 = vld [vmem:[%s1120_s28 + $0x378] sm:$0xff]  ;;  %v421_v22 = vmul.f32 %v1132_v6, %v292_v14  ;;  %v548_v27 = vadd.f32 %v1136_v9, %v419_v16 }
  0x91   : > { %653 = vst [vmem:[%s1155_s20 + $0x2a8] sm:$0xff] %v525_v20  ;;  %v294_v20 = vld [vmem:[%s1120_s28 + $0x380] sm:$0xff]  ;;  %v422_v25 = vmul.f32 %v1132_v6, %v293_v17  ;;  %v549_v30 = vadd.f32 %v1136_v9, %v420_v19 }
  0x92   : > { %654 = vst [vmem:[%s1155_s20 + $0x2b0] sm:$0xff] %v526_v23  ;;  %v295_v23 = vld [vmem:[%s1120_s28 + $0x388] sm:$0xff]  ;;  %v423_v28 = vmul.f32 %v1132_v6, %v294_v20  ;;  %v550_v33 = vadd.f32 %v1136_v9, %v421_v22 }
  0x93   : > { %655 = vst [vmem:[%s1155_s20 + $0x2b8] sm:$0xff] %v527_v26  ;;  %v296_v26 = vld [vmem:[%s1120_s28 + $0x390] sm:$0xff]  ;;  %v424_v31 = vmul.f32 %v1132_v6, %v295_v23  ;;  %v551_v36 = vadd.f32 %v1136_v9, %v422_v25 }
  0x94   : > { %656 = vst [vmem:[%s1155_s20 + $0x2c0] sm:$0xff] %v528_v29  ;;  %v297_v29 = vld [vmem:[%s1120_s28 + $0x398] sm:$0xff]  ;;  %v425_v34 = vmul.f32 %v1132_v6, %v296_v26  ;;  %v552_v39 = vadd.f32 %v1136_v9, %v423_v28 }
  0x95   : > { %657 = vst [vmem:[%s1155_s20 + $0x2c8] sm:$0xff] %v529_v32  ;;  %v298_v32 = vld [vmem:[%s1120_s28 + $0x3a0] sm:$0xff]  ;;  %v426_v37 = vmul.f32 %v1132_v6, %v297_v29  ;;  %v553_v42 = vadd.f32 %v1136_v9, %v424_v31 }
  0x96   : > { %658 = vst [vmem:[%s1155_s20 + $0x2d0] sm:$0xff] %v530_v35  ;;  %v299_v35 = vld [vmem:[%s1120_s28 + $0x3a8] sm:$0xff]  ;;  %v427_v40 = vmul.f32 %v1132_v6, %v298_v32  ;;  %v554_v45 = vadd.f32 %v1136_v9, %v425_v34 }
  0x97   : > { %659 = vst [vmem:[%s1155_s20 + $0x2d8] sm:$0xff] %v531_v38  ;;  %v300_v38 = vld [vmem:[%s1120_s28 + $0x3b0] sm:$0xff]  ;;  %v428_v43 = vmul.f32 %v1132_v6, %v299_v35  ;;  %v555_v48 = vadd.f32 %v1136_v9, %v426_v37 }
  0x98   : > { %660 = vst [vmem:[%s1155_s20 + $0x2e0] sm:$0xff] %v532_v41  ;;  %v301_v41 = vld [vmem:[%s1120_s28 + $0x3b8] sm:$0xff]  ;;  %v429_v46 = vmul.f32 %v1132_v6, %v300_v38  ;;  %v556_v51 = vadd.f32 %v1136_v9, %v427_v40 }
  0x99   : > { %661 = vst [vmem:[%s1155_s20 + $0x2e8] sm:$0xff] %v533_v44  ;;  %v302_v44 = vld [vmem:[%s1120_s28 + $0x3c0] sm:$0xff]  ;;  %v430_v49 = vmul.f32 %v1132_v6, %v301_v41  ;;  %v557_v54 = vadd.f32 %v1136_v9, %v428_v43 }
  0x9a   : > { %662 = vst [vmem:[%s1155_s20 + $0x2f0] sm:$0xff] %v534_v47  ;;  %v303_v47 = vld [vmem:[%s1120_s28 + $0x3c8] sm:$0xff]  ;;  %v431_v52 = vmul.f32 %v1132_v6, %v302_v44  ;;  %v558_v57 = vadd.f32 %v1136_v9, %v429_v46 }
  0x9b   : > { %663 = vst [vmem:[%s1155_s20 + $0x2f8] sm:$0xff] %v535_v50  ;;  %v304_v50 = vld [vmem:[%s1120_s28 + $0x3d0] sm:$0xff]  ;;  %v432_v55 = vmul.f32 %v1132_v6, %v303_v47  ;;  %v559_v60 = vadd.f32 %v1136_v9, %v430_v49 }
  0x9c   : > { %664 = vst [vmem:[%s1155_s20 + $0x300] sm:$0xff] %v536_v53  ;;  %v305_v53 = vld [vmem:[%s1120_s28 + $0x3d8] sm:$0xff]  ;;  %v433_v58 = vmul.f32 %v1132_v6, %v304_v50  ;;  %v560_v63 = vadd.f32 %v1136_v9, %v431_v52 }
  0x9d   : > { %665 = vst [vmem:[%s1155_s20 + $0x308] sm:$0xff] %v537_v56  ;;  %v306_v56 = vld [vmem:[%s1120_s28 + $0x3e0] sm:$0xff]  ;;  %v434_v61 = vmul.f32 %v1132_v6, %v305_v53  ;;  %v561_v2 = vadd.f32 %v1136_v9, %v432_v55 }
  0x9e   : > { %666 = vst [vmem:[%s1155_s20 + $0x310] sm:$0xff] %v538_v59  ;;  %v307_v59 = vld [vmem:[%s1120_s28 + $0x3e8] sm:$0xff]  ;;  %v435_v0 = vmul.f32 %v1132_v6, %v306_v56 }
  0x9f   : > { %667 = vst [vmem:[%s1155_s20 + $0x318] sm:$0xff] %v539_v62  ;;  %v308_v62 = vld [vmem:[%s1120_s28 + $0x3f0] sm:$0xff]  ;;  %v436_v3 = vmul.f32 %v1132_v6, %v307_v59  ;;  %v563_v7 = vadd.f32 %v1136_v9, %v434_v61 }
  0xa0   : > { %668 = vst [vmem:[%s1155_s20 + $0x320] sm:$0xff] %v540_v1  ;;  %v309_v1 = vld [vmem:[%s1120_s28 + $0x3f8] sm:$0xff]  ;;  %v437_v5 = vmul.f32 %v1132_v6, %v308_v62  ;;  %v564_v10 = vadd.f32 %v1136_v9, %v435_v0 }
  0xa1   : > { %669 = vst [vmem:[%s1155_s20 + $0x328] sm:$0xff] %v541_v4  ;;  %v562_v4 = vadd.f32 %v1136_v9, %v433_v58  ;;  %v565_v11 = vadd.f32 %v1136_v9, %v436_v3 }
  0xa2   : > { %670 = vst [vmem:[%s1155_s20 + $0x330] sm:$0xff] %v542_v8  ;;  %v438_v8 = vmul.f32 %v1132_v6, %v309_v1 }
  0xa3   : > { %671 = vst [vmem:[%s1155_s20 + $0x338] sm:$0xff] %v543_v12  ;;  %v566_v12 = vadd.f32 %v1136_v9, %v437_v5 }
  0xa4   : > { %672 = vst [vmem:[%s1155_s20 + $0x340] sm:$0xff] %v544_v15  ;;  %v567_v13 = vadd.f32 %v1136_v9, %v438_v8 }
  0xa5   : > { %673 = vst [vmem:[%s1155_s20 + $0x348] sm:$0xff] %v545_v18 }
  0xa6   : > { %674 = vst [vmem:[%s1155_s20 + $0x350] sm:$0xff] %v546_v21 }
  0xa7   : > { %675 = vst [vmem:[%s1155_s20 + $0x358] sm:$0xff] %v547_v24 }
  0xa8   : > { %676 = vst [vmem:[%s1155_s20 + $0x360] sm:$0xff] %v548_v27 }
  0xa9   : > { %677 = vst [vmem:[%s1155_s20 + $0x368] sm:$0xff] %v549_v30 }
  0xaa   : > { %678 = vst [vmem:[%s1155_s20 + $0x370] sm:$0xff] %v550_v33 }
  0xab   : > { %679 = vst [vmem:[%s1155_s20 + $0x378] sm:$0xff] %v551_v36 }
  0xac   : > { %680 = vst [vmem:[%s1155_s20 + $0x380] sm:$0xff] %v552_v39 }
  0xad   : > { %681 = vst [vmem:[%s1155_s20 + $0x388] sm:$0xff] %v553_v42 }
  0xae   : > { %682 = vst [vmem:[%s1155_s20 + $0x390] sm:$0xff] %v554_v45 }
  0xaf   : > { %683 = vst [vmem:[%s1155_s20 + $0x398] sm:$0xff] %v555_v48 }
  0xb0   : > { %684 = vst [vmem:[%s1155_s20 + $0x3a0] sm:$0xff] %v556_v51 }
  0xb1   : > { %685 = vst [vmem:[%s1155_s20 + $0x3a8] sm:$0xff] %v557_v54 }
  0xb2   : > { %686 = vst [vmem:[%s1155_s20 + $0x3b0] sm:$0xff] %v558_v57 }
  0xb3   : > { %687 = vst [vmem:[%s1155_s20 + $0x3b8] sm:$0xff] %v559_v60 }
  0xb4   : > { %688 = vst [vmem:[%s1155_s20 + $0x3c0] sm:$0xff] %v560_v63 }
  0xb5   : > { %689 = vst [vmem:[%s1155_s20 + $0x3c8] sm:$0xff] %v561_v2 }
  0xb6   : > { %690 = vst [vmem:[%s1155_s20 + $0x3d0] sm:$0xff] %v562_v4 }
  0xb7   : > { %691 = vst [vmem:[%s1155_s20 + $0x3d8] sm:$0xff] %v563_v7 }
  0xb8   : > { %692 = vst [vmem:[%s1155_s20 + $0x3e0] sm:$0xff] %v564_v10 }
  0xb9   : > { %693 = vst [vmem:[%s1155_s20 + $0x3e8] sm:$0xff] %v565_v11 }
  0xba   : > { %694 = vst [vmem:[%s1155_s20 + $0x3f0] sm:$0xff] %v566_v12 }
  0xbb   : > { %695 = vst [vmem:[%s1155_s20 + $0x3f8] sm:$0xff] %v567_v13 }
  0xbc   : > { %949 = shalt.err (!%p946_p8)
}
  0xbd   : > { %s997_s4 = smov 128   ;;  %s998_s7 = smov 8  }
  0xbe   : > { %822 = dma.vmem_to_hbm [thread:$0]  (%p1066_p11), %s710_s17, 16384, %s712_s19, %s697_s24, %s997_s4, %s997_s4, %s998_s7  }
  0xbf PF: > { %p839_p9 = scmp.ge.s32.totalorder %s992_s12, 2  ;;  %s726_s28 = sand.u32 1, %s980_s9  }
  0xc0   : > { %s727_s23 = scalar_lea.sflag [#allocation4], %s726_s28 }
  0xc1   : > { %p833_p10 = pnand %p839_p9, %p1070_p12 }
  0xc3   : > { %p834_p1 = pneg %p833_p10 }
  0xc5   : > { %975 = dma.done.wait (%p834_p1), %s727_s23, 16384  }
  0xc6   : > { %977 = vsyncadd (%p834_p1), %s727_s23, 4294950912  ;;  %p16_p0 = scmp.ge.s32.totalorder %s1039_s15, 5   ;;  %s1688_s9 = smov %s984_s10 }
  0xc7   : > { %s1689_s10 = smov %s988_s11  ;;  %s1690_s11 = smov %s1051_s18 }
  0xc8   : > { %s1691_s12 = smov %s1039_s15  ;;  %18 = sbr.rel (!%p16_p0) target bundleno = 6 (0x6), region = 78 }
  0xcd   :  { %733 = vsyncpa [#allocation3], 1 }
  0xce   :  { %735 = vsyncpa [#allocation3 + $0x1], 1 }
  0xcf   :  { %736 = vsyncpa [#allocation4], 1 }
  0xd0   :  { %738 = vsyncpa [#allocation4 + $0x1], 1 }
  0xd1   :  { %739 = vsyncpa [#allocation5], 1 }
  0xd2   :  { %741 = vsyncpa [#allocation5 + $0x1], 1 }

</bundles_post_ra>
